<compile_context>
chip_gen: v6e
topology: v6e:2x2x1
jax: 0.10.0
libtpu: 0.0.40
codegen_flags: <defaults>
</compile_context>

<pallas_src>
import functools

import jax
import jax.numpy as jnp
from jax.experimental import pallas as pl
from jax.experimental.pallas import tpu as pltpu

_OUT_LANES = 128  # lane-dense packed output width (>= num_actions + 1)


# ----------------------------- kernels -----------------------------

def _ppo_fused_kernel(x_ref, w1_ref, b1_ref, w2_ref, b2_ref, w3_ref, b3_ref, out_ref):
    # MXU sees bf16 operands; accumulation / bias / ReLU stay f32.
    x = x_ref[...].astype(jnp.bfloat16)                                    # (bm, S)
    h = jnp.dot(x, w1_ref[...], preferred_element_type=jnp.float32) + b1_ref[...]
    h = jnp.maximum(h, 0.0).astype(jnp.bfloat16)                           # (bm, 2*h1)
    g = jnp.dot(h, w2_ref[...], preferred_element_type=jnp.float32) + b2_ref[...]
    g = jnp.maximum(g, 0.0).astype(jnp.bfloat16)                           # (bm, 2*h2)
    out = jnp.dot(g, w3_ref[...], preferred_element_type=jnp.float32) + b3_ref[...]
    out_ref[...] = out.astype(out_ref.dtype)                               # (bm, 128)


def _ppo_split_w2_kernel(x_ref, w1_ref, b1_ref, pw2_ref, vw2_ref, b2_ref,
                         w3_ref, b3_ref, out_ref, *, h1):
    # v5e variant: split the block-diagonal W2 so the 128x128 MXU never multiplies
    # guaranteed-zero tiles.
    x = x_ref[...].astype(jnp.bfloat16)                                    # (bm, S)
    h = jnp.dot(x, w1_ref[...], preferred_element_type=jnp.float32) + b1_ref[...]
    h = jnp.maximum(h, 0.0).astype(jnp.bfloat16)                           # (bm, 2*h1)
    gp = jnp.dot(h[:, :h1], pw2_ref[...], preferred_element_type=jnp.float32)
    gv = jnp.dot(h[:, h1:], vw2_ref[...], preferred_element_type=jnp.float32)
    g = jnp.concatenate([gp, gv], axis=-1) + b2_ref[...]                   # (bm, 2*h2)
    g = jnp.maximum(g, 0.0).astype(jnp.bfloat16)
    out = jnp.dot(g, w3_ref[...], preferred_element_type=jnp.float32) + b3_ref[...]
    out_ref[...] = out.astype(out_ref.dtype)                               # (bm, 128)


# ----------------------------- packing / wrapper -----------------------------

def pack_fused_params(params, *, weight_dtype=jnp.bfloat16):
    """Pack the 12 per-layer arrays into fused buffers (done once, outside the kernel)."""
    h1 = params["policy_w1"].shape[1]
    h2 = params["policy_w2"].shape[1]
    A = params["policy_w3"].shape[1]
    assert A + 1 <= _OUT_LANES, "num_actions+1 must fit in one 128-lane output slab"
    wd = weight_dtype

    w1 = jnp.concatenate([params["policy_w1"], params["value_w1"]], axis=1).astype(wd)
    b1 = jnp.concatenate([params["policy_b1"], params["value_b1"]], axis=1).astype(jnp.float32)

    pw2 = params["policy_w2"].astype(wd)                                   # [h1, h2]
    vw2 = params["value_w2"].astype(wd)                                    # [h1, h2]
    w2 = jnp.zeros((2 * h1, 2 * h2), wd)                                   # block-diag
    w2 = w2.at[:h1, :h2].set(pw2).at[h1:, h2:].set(vw2)
    b2 = jnp.concatenate([params["policy_b2"], params["value_b2"]], axis=1).astype(jnp.float32)

    w3 = jnp.zeros((2 * h2, _OUT_LANES), wd)
    w3 = w3.at[:h2, :A].set(params["policy_w3"].astype(wd))
    w3 = w3.at[h2:, A:A + 1].set(params["value_w3"].astype(wd))
    b3 = jnp.zeros((1, _OUT_LANES), jnp.float32)
    b3 = b3.at[:, :A].set(params["policy_b3"]).at[:, A:A + 1].set(params["value_b3"])

    return {
        "w1": w1, "b1": b1,
        "w2": w2, "pw2": pw2, "vw2": vw2, "b2": b2,
        "w3": w3, "b3": b3,
        "log_std": params["log_std"],
        "num_actions": A, "h1": h1, "h2": h2,
    }


def _round_up(n, m):
    return ((n + m - 1) // m) * m


def _is_v5e():
    try:
        kind = jax.devices()[0].device_kind.lower()
        return ("v5 lite" in kind) or ("v5e" in kind) or ("v5litepod" in kind)
    except Exception:
        return False


def ppo_forward(x, packed, *, block_b=1024, split_w2=None, return_packed=False):
    """Fused policy+value forward.

    Returns (p_mean, p_scale, v), or (packed_out[B,128], p_scale) when
    return_packed=True (cols [0:A] = p_mean, col [A] = v) so large-batch callers
    can skip the extra slice passes over HBM.
    """
    B, S = x.shape
    A = packed["num_actions"]
    h1 = packed["h1"]

    if split_w2 is None:
        split_w2 = _is_v5e()

    # Batch tile: no jnp.pad copy -- Pallas masks the partial last block.
    if B <= 16:
        bm = B  # single full-extent block (exempt from the 8-sublane divisibility rule)
    else:
        # Multiple of 8 sublanes, capped at block_b, and >=2 grid steps so both
        # v7x TensorCores get work via dimension_semantics=("parallel",).
        bm = min(_round_up(block_b, 8), _round_up(pl.cdiv(B, 2), 8))
    grid = (pl.cdiv(B, bm),)

    if split_w2:
        kernel = functools.partial(_ppo_split_w2_kernel, h1=h1)
        w_args = (packed["w1"], packed["b1"], packed["pw2"], packed["vw2"],
                  packed["b2"], packed["w3"], packed["b3"])
    else:
        kernel = _ppo_fused_kernel
        w_args = (packed["w1"], packed["b1"], packed["w2"],
                  packed["b2"], packed["w3"], packed["b3"])

    in_specs = [pl.BlockSpec((bm, S), lambda i: (i, 0))]          # x: tiled over batch
    in_specs += [pl.BlockSpec(w.shape, lambda i: (0, 0)) for w in w_args]  # resident weights

    out = pl.pallas_call(
        kernel,
        out_shape=jax.ShapeDtypeStruct((B, _OUT_LANES), jnp.float32),
        grid_spec=pltpu.PrefetchScalarGridSpec(
            num_scalar_prefetch=0,
            grid=grid,
            in_specs=in_specs,
            out_specs=pl.BlockSpec((bm, _OUT_LANES), lambda i: (i, 0)),
        ),
        compiler_params=pltpu.CompilerParams(
            dimension_semantics=("parallel",),
        ),
    )(x, *w_args)

    p_scale = jnp.exp(packed["log_std"])  # no x-dependence: plain JAX
    if return_packed:
        return out, p_scale
    return out[:, :A], p_scale, out[:, A:A + 1]


# ----------------------------- parameter init -----------------------------

def _xavier_uniform(key, fan_in, fan_out):
    # torch.nn.init.xavier_uniform_ on a [out, in] weight; we store [in, out].
    limit = jnp.sqrt(6.0 / (fan_in + fan_out))
    return jax.random.uniform(
        key, (fan_in, fan_out), dtype=jnp.float32, minval=-limit, maxval=limit
    )


def init_params(key, num_states, num_actions, h1=256, h2=128):
    keys = jax.random.split(key, 6)
    return {
        # Policy head (weights stored [in, out]; biases as (1, out) rows).
        "policy_w1": _xavier_uniform(keys[0], num_states, h1),
        "policy_b1": jnp.zeros((1, h1), jnp.float32),
        "policy_w2": _xavier_uniform(keys[1], h1, h2),
        "policy_b2": jnp.zeros((1, h2), jnp.float32),
        "policy_w3": _xavier_uniform(keys[2], h2, num_actions),
        "policy_b3": jnp.zeros((1, num_actions), jnp.float32),
        "log_std": jnp.zeros((num_actions,), jnp.float32),
        # Value head.
        "value_w1": _xavier_uniform(keys[3], num_states, h1),
        "value_b1": jnp.zeros((1, h1), jnp.float32),
        "value_w2": _xavier_uniform(keys[4], h1, h2),
        "value_b2": jnp.zeros((1, h2), jnp.float32),
        "value_w3": _xavier_uniform(keys[5], h2, 1),
        "value_b3": jnp.zeros((1, 1), jnp.float32),
    }


def _reference(x, p):
    """Pure-JAX f32 reference (mirrors Model.forward)."""
    h = jax.nn.relu(x @ p["policy_w1"] + p["policy_b1"])
    h = jax.nn.relu(h @ p["policy_w2"] + p["policy_b2"])
    p_mean = h @ p["policy_w3"] + p["policy_b3"]
    p_scale = jnp.exp(p["log_std"])
    g = jax.nn.relu(x @ p["value_w1"] + p["value_b1"])
    g = jax.nn.relu(g @ p["value_w2"] + p["value_b2"])
    v = g @ p["value_w3"] + p["value_b3"]
    return p_mean, p_scale, v


if __name__ == "__main__":
    num_states = 32
    num_actions = 8
    batch = 8

    key = jax.random.PRNGKey(0)
    pkey, xkey = jax.random.split(key)
    params = init_params(pkey, num_states, num_actions)
    packed = pack_fused_params(params)
    x = jax.random.normal(xkey, (batch, num_states), dtype=jnp.float32)

    r_mean, r_scale, r_v = _reference(x, params)

    # Exercise both kernel variants (fused W2 for v6e/v7x, split W2 for v5e).
    for split in (False, True):
        p_mean, p_scale, v = jax.block_until_ready(
            ppo_forward(x, packed, split_w2=split)
        )
        assert p_mean.shape == (batch, num_actions)
        assert p_scale.shape == (num_actions,)
        assert v.shape == (batch, 1)
        # bf16 MXU operands (f32 accumulation) => looser tolerances vs the f32 reference.
        assert jnp.allclose(p_mean, r_mean, atol=5e-2, rtol=5e-2), (
            f"p_mean mismatch (split_w2={split})")
        assert jnp.allclose(v, r_v, atol=5e-2, rtol=5e-2), (
            f"value mismatch (split_w2={split})")
        assert jnp.allclose(p_scale, r_scale, atol=1e-6)

    print("KERNEL_OK")
</pallas_src>

<mosaic_0001>
module attributes {stable_mosaic.version = 11 : i64} {
  func.func @_ppo_fused_kernel(%arg0: i32, %arg1: memref<8x32xf32, #tpu.memory_space<vmem>>, %arg2: memref<32x512xbf16, #tpu.memory_space<vmem>>, %arg3: memref<1x512xf32, #tpu.memory_space<vmem>>, %arg4: memref<512x256xbf16, #tpu.memory_space<vmem>>, %arg5: memref<1x256xf32, #tpu.memory_space<vmem>>, %arg6: memref<256x128xbf16, #tpu.memory_space<vmem>>, %arg7: memref<1x128xf32, #tpu.memory_space<vmem>>, %arg8: memref<8x128xf32, #tpu.memory_space<vmem>>) attributes {dimension_semantics = [#tpu.dimension_semantics<parallel>], iteration_bounds = array<i64: 1>, scalar_prefetch = 0 : i64, scratch_operands = 0 : i64, tpu.core_type = #tpu.core_type<tc>, window_params = [{transform_indices = @transform_0, window_bounds = array<i64: 8, 32>}, {pipeline_mode = #tpu.pipeline_mode<synchronous>, transform_indices = @transform_1, window_bounds = array<i64: 32, 512>}, {pipeline_mode = #tpu.pipeline_mode<synchronous>, transform_indices = @transform_2, window_bounds = array<i64: 1, 512>}, {pipeline_mode = #tpu.pipeline_mode<synchronous>, transform_indices = @transform_3, window_bounds = array<i64: 512, 256>}, {pipeline_mode = #tpu.pipeline_mode<synchronous>, transform_indices = @transform_4, window_bounds = array<i64: 1, 256>}, {pipeline_mode = #tpu.pipeline_mode<synchronous>, transform_indices = @transform_5, window_bounds = array<i64: 256, 128>}, {pipeline_mode = #tpu.pipeline_mode<synchronous>, transform_indices = @transform_6, window_bounds = array<i64: 1, 128>}, {transform_indices = @transform_7, window_bounds = array<i64: 8, 128>}]} {
    %c0 = arith.constant 0 : index
    %c0_0 = arith.constant 0 : index
    %0 = vector.load %arg1[%c0, %c0_0] : memref<8x32xf32, #tpu.memory_space<vmem>>, vector<8x32xf32>
    %1 = arith.truncf %0 : vector<8x32xf32> to vector<8x32xbf16>
    %c0_1 = arith.constant 0 : index
    %c0_2 = arith.constant 0 : index
    %2 = vector.load %arg2[%c0_1, %c0_2] : memref<32x512xbf16, #tpu.memory_space<vmem>>, vector<32x512xbf16>
    %cst = arith.constant dense<0.000000e+00> : vector<8x512xf32>
    %3 = tpu.matmul %1, %2, %cst {dimension_numbers = #tpu.dot_dimension_numbers<[1], [0], [0], [1], [0, 0, 1, 1], [], []>} : vector<8x32xbf16>, vector<32x512xbf16>, vector<8x512xf32> -> vector<8x512xf32>
    %c0_3 = arith.constant 0 : index
    %c0_4 = arith.constant 0 : index
    %4 = vector.load %arg3[%c0_3, %c0_4] : memref<1x512xf32, #tpu.memory_space<vmem>>, vector<1x512xf32>
    %5 = vector.broadcast %4 : vector<1x512xf32> to vector<8x512xf32>
    %6 = arith.addf %3, %5 : vector<8x512xf32>
    %cst_5 = arith.constant 0.000000e+00 : f32
    %7 = vector.broadcast %cst_5 : f32 to vector<8x512xf32>
    %8 = arith.maximumf %6, %7 : vector<8x512xf32>
    %9 = arith.truncf %8 : vector<8x512xf32> to vector<8x512xbf16>
    %c0_6 = arith.constant 0 : index
    %c0_7 = arith.constant 0 : index
    %10 = vector.load %arg4[%c0_6, %c0_7] : memref<512x256xbf16, #tpu.memory_space<vmem>>, vector<512x256xbf16>
    %cst_8 = arith.constant dense<0.000000e+00> : vector<8x256xf32>
    %11 = tpu.matmul %9, %10, %cst_8 {dimension_numbers = #tpu.dot_dimension_numbers<[1], [0], [0], [1], [0, 0, 1, 1], [], []>} : vector<8x512xbf16>, vector<512x256xbf16>, vector<8x256xf32> -> vector<8x256xf32>
    %c0_9 = arith.constant 0 : index
    %c0_10 = arith.constant 0 : index
    %12 = vector.load %arg5[%c0_9, %c0_10] : memref<1x256xf32, #tpu.memory_space<vmem>>, vector<1x256xf32>
    %13 = vector.broadcast %12 : vector<1x256xf32> to vector<8x256xf32>
    %14 = arith.addf %11, %13 : vector<8x256xf32>
    %cst_11 = arith.constant 0.000000e+00 : f32
    %15 = vector.broadcast %cst_11 : f32 to vector<8x256xf32>
    %16 = arith.maximumf %14, %15 : vector<8x256xf32>
    %17 = arith.truncf %16 : vector<8x256xf32> to vector<8x256xbf16>
    %c0_12 = arith.constant 0 : index
    %c0_13 = arith.constant 0 : index
    %18 = vector.load %arg6[%c0_12, %c0_13] : memref<256x128xbf16, #tpu.memory_space<vmem>>, vector<256x128xbf16>
    %cst_14 = arith.constant dense<0.000000e+00> : vector<8x128xf32>
    %19 = tpu.matmul %17, %18, %cst_14 {dimension_numbers = #tpu.dot_dimension_numbers<[1], [0], [0], [1], [0, 0, 1, 1], [], []>} : vector<8x256xbf16>, vector<256x128xbf16>, vector<8x128xf32> -> vector<8x128xf32>
    %c0_15 = arith.constant 0 : index
    %c0_16 = arith.constant 0 : index
    %20 = vector.load %arg7[%c0_15, %c0_16] : memref<1x128xf32, #tpu.memory_space<vmem>>, vector<1x128xf32>
    %21 = vector.broadcast %20 : vector<1x128xf32> to vector<8x128xf32>
    %22 = arith.addf %19, %21 : vector<8x128xf32>
    %c0_17 = arith.constant 0 : index
    %c0_18 = arith.constant 0 : index
    %23 = vector.load %arg8[%c0_17, %c0_18] : memref<8x128xf32, #tpu.memory_space<vmem>>, vector<8x128xf32>
    tpu.vector_store %arg8[%c0_17, %c0_18], %22 {strides = array<i32>} : memref<8x128xf32, #tpu.memory_space<vmem>>, vector<8x128xf32>,
    return
  }
  func.func @transform_0(%arg0: i32) -> (i32, i32) {
    %c0_i32 = arith.constant 0 : i32
    %c0_i32_0 = arith.constant 0 : i32
    return %arg0, %c0_i32 : i32, i32
  }
  func.func @transform_1(%arg0: i32) -> (i32, i32) {
    %c0_i32 = arith.constant 0 : i32
    %c0_i32_0 = arith.constant 0 : i32
    %c0_i32_1 = arith.constant 0 : i32
    return %c0_i32, %c0_i32_0 : i32, i32
  }
  func.func @transform_2(%arg0: i32) -> (i32, i32) {
    %c0_i32 = arith.constant 0 : i32
    %c0_i32_0 = arith.constant 0 : i32
    %c0_i32_1 = arith.constant 0 : i32
    return %c0_i32, %c0_i32_0 : i32, i32
  }
  func.func @transform_3(%arg0: i32) -> (i32, i32) {
    %c0_i32 = arith.constant 0 : i32
    %c0_i32_0 = arith.constant 0 : i32
    %c0_i32_1 = arith.constant 0 : i32
    return %c0_i32, %c0_i32_0 : i32, i32
  }
  func.func @transform_4(%arg0: i32) -> (i32, i32) {
    %c0_i32 = arith.constant 0 : i32
    %c0_i32_0 = arith.constant 0 : i32
    %c0_i32_1 = arith.constant 0 : i32
    return %c0_i32, %c0_i32_0 : i32, i32
  }
  func.func @transform_5(%arg0: i32) -> (i32, i32) {
    %c0_i32 = arith.constant 0 : i32
    %c0_i32_0 = arith.constant 0 : i32
    %c0_i32_1 = arith.constant 0 : i32
    return %c0_i32, %c0_i32_0 : i32, i32
  }
  func.func @transform_6(%arg0: i32) -> (i32, i32) {
    %c0_i32 = arith.constant 0 : i32
    %c0_i32_0 = arith.constant 0 : i32
    %c0_i32_1 = arith.constant 0 : i32
    return %c0_i32, %c0_i32_0 : i32, i32
  }
  func.func @transform_7(%arg0: i32) -> (i32, i32) {
    %c0_i32 = arith.constant 0 : i32
    %c0_i32_0 = arith.constant 0 : i32
    return %arg0, %c0_i32 : i32, i32
  }
}

</mosaic_0001>

<bundles_post_ra>
// kernel: tpu_custom_call.1
= control target key start
LH: loop header
LB: loop body
LE: loop exit
PB: predicated region body
PF: predicated region fallthrough
CT: control target
= control target key end

     0   :  { %12 = vsyncpa [#allocation3], 0  ;;  %s1404_s0 = inlined_call_operand.hbm [shape: f32[8,32], index: 0, kind: input, shape index: {}]   ;;  %s1405_s1 = inlined_call_operand.hbm [shape: bf16[32,512], index: 1, kind: input, shape index: {}]   ;;  %s1406_s2 = inlined_call_operand.hbm [shape: f32[1,512], index: 2, kind: input, shape index: {}]   ;;  %s1407_s3 = inlined_call_operand.hbm [shape: bf16[512,256], index: 3, kind: input, shape index: {}]   ;;  %s1408_s4 = inlined_call_operand.vmem [shape: f32[1,256], index: 4, kind: input, shape index: {}]   ;;  %s1409_s5 = inlined_call_operand.hbm [shape: bf16[256,128], index: 5, kind: input, shape index: {}]   ;;  %s1410_s6 = inlined_call_operand.vmem [shape: f32[1,128], index: 6, kind: input, shape index: {}]   ;;  %s1411_s7 = inlined_call_operand.hbm [shape: f32[8,128], index: 7, kind: output, shape index: {}]  }
   0x1   :  { %13 = vsyncpa [#allocation6], 0 }
   0x2   :  { %14 = vsyncpa [#allocation9], 0 }
   0x3   :  { %15 = vsyncpa [#allocation4], 0  ;;  %s1311_s24 = smov [#allocation5]  }
   0x4   :  { %s31_s25 = sshll.u32 %s1311_s24, 4  ;;  %s32_s25 = int_to_ptr.vmem [resolvable:$true] %s31_s25 }
   0x5   :  { %s1191_s26 = scalar_lea.vmem %s32_s25, 1024  ;;  %p1196_p1 = scmp.lt.s32.totalorder %s32_s25, %s32_s25 }
   0x6   :  { %p1192_p0 = scmp.ne.s32.totalorder %s32_s25, %s1191_s26  ;;  %p1197_p2 = scmp.lt.s32.totalorder %s1191_s26, %s1191_s26 }
   0x8   :  { %p1198_p3 = por %p1197_p2, %p1196_p1 }
   0xa   :  { %p1199_p4 = pnand %p1198_p3, %p1192_p0 }
   0xc   :  { %1202 = shalt.err (!%p1199_p4)
}
   0xd   :  { %s1312_s27 = smov 256   ;;  %s1313_s28 = smov 16  }
   0xe   :  { %37 = dma.hbm_to_vmem [thread:$0]  %s1405_s1, 1024, %s32_s25, [#allocation6], %s1312_s27, %s1312_s27, %s1313_s28  }
   0xf   :  { %s1314_s8 = smov [#allocation8]  }
  0x10   :  { %s53_s9 = sshll.u32 %s1314_s8, 4  ;;  %s54_s9 = int_to_ptr.vmem [resolvable:$true] %s53_s9 }
  0x11   :  { %s1211_s10 = scalar_lea.vmem %s54_s9, 8192  ;;  %p1216_p6 = scmp.lt.s32.totalorder %s54_s9, %s54_s9 }
  0x12   :  { %p1212_p5 = scmp.ne.s32.totalorder %s54_s9, %s1211_s10  ;;  %p1217_p7 = scmp.lt.s32.totalorder %s1211_s10, %s1211_s10 }
  0x14   :  { %p1218_p8 = por %p1217_p7, %p1216_p6 }
  0x16   :  { %p1219_p9 = pnand %p1218_p8, %p1212_p5 }
  0x18   :  { %1222 = shalt.err (!%p1219_p9)
}
  0x19   :  { %s1315_s11 = smov 128   ;;  %s1316_s12 = smov 8  }
  0x1a   :  { %59 = dma.hbm_to_vmem [thread:$0]  %s1407_s3, 8192, %s54_s9, [#allocation9], %s1315_s11, %s1315_s11, %s1316_s12  }
  0x1b   :  { %s1317_s15 = smov [#allocation2]   ;;  %s1318_s17 = smov [#allocation7]  }
  0x1c   :  { %s22_s16 = sshll.u32 %s1317_s15, 4  ;;  %s44_s1 = sshll.u32 %s1318_s17, 4  ;;  %s23_s16 = int_to_ptr.vmem [resolvable:$true] %s22_s16  ;;  %s45_s1 = int_to_ptr.vmem [resolvable:$true] %s44_s1 }
  0x1d   :  { %s1231_s18 = scalar_lea.vmem %s23_s16, 128  ;;  %p1236_p11 = scmp.lt.s32.totalorder %s23_s16, %s23_s16 }
  0x1e   :  { %p1232_p10 = scmp.ne.s32.totalorder %s23_s16, %s1231_s18  ;;  %p1237_p12 = scmp.lt.s32.totalorder %s1231_s18, %s1231_s18 }
  0x20   :  { %p1238_p13 = por %p1237_p12, %p1236_p11 }
  0x22   :  { %p1239_p0 = pnand %p1238_p13, %p1232_p10 }
  0x24   :  { %1242 = shalt.err (!%p1239_p0)
}
  0x25   :  { %25 = dma.hbm_to_vmem [thread:$0]  %s1404_s0, 128, %s23_s16, [#allocation3]  }
  0x26   :  { %s1251_s21 = scalar_lea.vmem %s45_s1, 64  ;;  %p1256_p2 = scmp.lt.s32.totalorder %s45_s1, %s45_s1 }
  0x27   :  { %p1252_p1 = scmp.ne.s32.totalorder %s45_s1, %s1251_s21  ;;  %p1257_p3 = scmp.lt.s32.totalorder %s1251_s21, %s1251_s21 }
  0x29   :  { %p1258_p4 = por %p1257_p3, %p1256_p2 }
  0x2b   :  { %p1259_p5 = pnand %p1258_p4, %p1252_p1 }
  0x2d   :  { %1262 = shalt.err (!%p1259_p5)
}
  0x2e   :  { %47 = dma.hbm_to_vmem [thread:$0]  %s1406_s2, 64, %s45_s1, [#allocation6]  }
  0x2f   :  { %s1319_s23 = smov [#allocation10]  }
  0x30   :  { %s67_s24 = sshll.u32 %s1319_s23, 4  ;;  %s68_s24 = int_to_ptr.vmem [resolvable:$true] %s67_s24 }
  0x31   :  { %s1271_s25 = scalar_lea.vmem %s68_s24, 2048  ;;  %p1276_p7 = scmp.lt.s32.totalorder %s68_s24, %s68_s24 }
  0x32   :  { %p1272_p6 = scmp.ne.s32.totalorder %s68_s24, %s1271_s25  ;;  %p1277_p8 = scmp.lt.s32.totalorder %s1271_s25, %s1271_s25 }
  0x34   :  { %p1278_p9 = por %p1277_p8, %p1276_p7 }
  0x36   :  { %p1279_p10 = pnand %p1278_p9, %p1272_p6 }
  0x38   :  { %1282 = shalt.err (!%p1279_p10)
}
  0x39   :  { %s1320_s0 = smov 64   ;;  %s1321_s26 = smov 4  }
  0x3a   :  { %73 = dma.hbm_to_vmem [thread:$0]  %s1409_s5, 2048, %s68_s24, [#allocation9], %s1320_s0, %s1320_s0, %s1321_s26  }
  0x3b   :  { %1303 = dma.done.wait [#allocation3], 128  }
  0x3c   :  { %1304 = vsyncadd [#allocation3], 4294967168 }
  0x3d   :  { %1305 = dma.done.wait [#allocation6], 1088  }
  0x3e   :  { %1306 = vsyncadd [#allocation6], 4294966208 }
  0x3f   :  { %1307 = dma.done.wait [#allocation9], 10240  }
  0x40   :  { %1308 = vsyncadd [#allocation9], 4294957056  ;;  %v1322_v0 = vmov 0   ;;  %v1059_v1 = vld [vmem:[#allocation5 + $0x24] ss:$16 sps:$4 sm:$0xff]   ;;  %v92_v5 = vld [vmem:[#allocation2] sm:$0xff] }
  0x41   :  { %200 = vmatprep.mubr.bf16.mxu1 %v1322_v0  ;;  %v1061_v2 = vld [vmem:[#allocation5 + $0x20] ss:$16 sps:$4 sm:$0xff]   ;;  %180 = vmatprep.subr.bf16.mxu1 %v1059_v1  ;;  %v1062_v3 = vld [vmem:[#allocation5 + $0x4] ss:$16 sps:$4 sm:$0xff]   ;;  %v1067_v6 = vld [vmem:[#allocation5 + $0x2c] ss:$16 sps:$4 sm:$0xff]   ;;  %v93_v8 = vpack.c.bf16 %v92_v5, %v92_v5 }
  0x42   :  { %v1064_v4 = vld [vmem:[#allocation5] ss:$16 sps:$4 sm:$0xff]   ;;  %181 = vmatpush1.bf16.msra.mxu1 %v1061_v2  ;;  %v1065_v7 = vld [vmem:[#allocation5 + $0x28] ss:$16 sps:$4 sm:$0xff]   ;;  %v1073_v10 = vld [vmem:[#allocation8 + $0x70] ss:$8 sps:$4 sm:$0xff]  }
  0x43   :  { %182 = vmatprep.subr.bf16.mxu1 %v1062_v3  ;;  %v1071_v9 = vld [vmem:[#allocation8 + $0x74] ss:$8 sps:$4 sm:$0xff]   ;;  %vm164_vm0 = vcmask 261120   ;;  %v1074_v11 = vld [vmem:[#allocation8 + $0x64] ss:$8 sps:$4 sm:$0xff]   ;;  %s1323_s30 = smov [#allocation11]  }
  0x44   :  { %v1070_v12 = vld [vmem:[#allocation5 + $0xc] ss:$16 sps:$4 sm:$0xff]   ;;  %654 = vmatprep.subr.bf16.mxu0 %v1071_v9  ;;  %v1077_v14 = vld [vmem:[#allocation8 + $0x54] ss:$8 sps:$4 sm:$0xff]   ;;  %v1083_v18 = vld [vmem:[#allocation8 + $0x44] ss:$8 sps:$4 sm:$0xff]  }
  0x45   :  { %655 = vmatpush1.bf16.msra.mxu0 %v1073_v10  ;;  %v1076_v13 = vld [vmem:[#allocation8 + $0x60] ss:$8 sps:$4 sm:$0xff]   ;;  %v1068_v15 = vld [vmem:[#allocation5 + $0x8] ss:$16 sps:$4 sm:$0xff]   ;;  %v1082_v17 = vld [vmem:[#allocation8 + $0x50] ss:$8 sps:$4 sm:$0xff]  }
  0x46   :  { %183 = vmatpush1.bf16.msra.mxu1 %v1064_v4  ;;  %656 = vmatprep.subr.bf16.mxu0 %v1074_v11  ;;  %v1081_v16 = vld [vmem:[#allocation8 + $0x174] ss:$8 sps:$4 sm:$0xff]   ;;  %v1079_v19 = vld [vmem:[#allocation8 + $0x170] ss:$8 sps:$4 sm:$0xff]   ;;  %v1087_v20 = vld [vmem:[#allocation8 + $0x164] ss:$8 sps:$4 sm:$0xff]  }
  0x47   :  { %221 = vmatprep.subr.bf16.mxu1 %v1067_v6  ;;  %v1088_v21 = vld [vmem:[#allocation8 + $0x40] ss:$8 sps:$4 sm:$0xff]   ;;  %v1089_v22 = vld [vmem:[#allocation8 + $0x34] ss:$8 sps:$4 sm:$0xff]   ;;  %v1094_v25 = vld [vmem:[#allocation8 + $0x30] ss:$8 sps:$4 sm:$0xff]  }
  0x48   :  { %v1085_v23 = vld [vmem:[#allocation8 + $0x160] ss:$8 sps:$4 sm:$0xff]   ;;  %v1093_v24 = vld [vmem:[#allocation8 + $0x154] ss:$8 sps:$4 sm:$0xff]   ;;  %v1095_v26 = vld [vmem:[#allocation8 + $0x24] ss:$8 sps:$4 sm:$0xff]  }
  0x49   :  { %941 = vmatmul.mubr.msk.bf16.vlgmr.msra.gmra.mxu1 %vm164_vm0, %v93_v8  ;;  %657 = vmatpush1.bf16.msra.mxu0 %v1076_v13  ;;  %v1091_v27 = vld [vmem:[#allocation8 + $0x150] ss:$8 sps:$4 sm:$0xff]   ;;  %v1099_v28 = vld [vmem:[#allocation8 + $0x144] ss:$8 sps:$4 sm:$0xff]   ;;  %v1100_v29 = vld [vmem:[#allocation8 + $0x20] ss:$8 sps:$4 sm:$0xff]  }
  0x4a   :  { %222 = vmatpush1.bf16.msra.mxu1 %v1065_v7  ;;  %241 = vmatprep.mubr.bf16.mxu1 %v1322_v0  ;;  %v1101_v30 = vld [vmem:[#allocation8 + $0x14] ss:$8 sps:$4 sm:$0xff]   ;;  %v1097_v31 = vld [vmem:[#allocation8 + $0x140] ss:$8 sps:$4 sm:$0xff]   ;;  %v1106_v33 = vld [vmem:[#allocation8 + $0x10] ss:$8 sps:$4 sm:$0xff]  }
  0x4b   :  { %223 = vmatprep.subr.bf16.mxu1 %v1070_v12  ;;  %658 = vmatprep.subr.bf16.mxu0 %v1077_v14  ;;  %v1105_v32 = vld [vmem:[#allocation8 + $0x134] ss:$8 sps:$4 sm:$0xff]   ;;  %v1107_v34 = vld [vmem:[#allocation8 + $0x4] ss:$8 sps:$4 sm:$0xff]   ;;  %v1103_v35 = vld [vmem:[#allocation8 + $0x130] ss:$8 sps:$4 sm:$0xff]   ;;  %v104_v12 = vlaneseq }
  0x4c   :  { %v1111_v36 = vld [vmem:[#allocation8 + $0x124] ss:$8 sps:$4 sm:$0xff]   ;;  %v1112_v37 = vld [vmem:[#allocation8] ss:$8 sps:$4 sm:$0xff]   ;;  %v1113_v38 = vld [vmem:[#allocation8 + $0xf4] ss:$8 sps:$4 sm:$0xff]  }
  0x4d   :  { %659 = vmatpush1.bf16.msra.mxu0 %v1082_v17  ;;  %v1109_v39 = vld [vmem:[#allocation8 + $0x120] ss:$8 sps:$4 sm:$0xff]   ;;  %v1117_v40 = vld [vmem:[#allocation8 + $0x114] ss:$8 sps:$4 sm:$0xff]   ;;  %v1118_v41 = vld [vmem:[#allocation8 + $0xf0] ss:$8 sps:$4 sm:$0xff]  }
  0x4e   :  { %224 = vmatpush1.bf16.msra.mxu1 %v1068_v15  ;;  %660 = vmatprep.subr.bf16.mxu0 %v1083_v18  ;;  %v1119_v42 = vld [vmem:[#allocation8 + $0xe4] ss:$8 sps:$4 sm:$0xff]   ;;  %v1115_v43 = vld [vmem:[#allocation8 + $0x110] ss:$8 sps:$4 sm:$0xff]   ;;  %v1124_v45 = vld [vmem:[#allocation8 + $0xe0] ss:$8 sps:$4 sm:$0xff]  }
  0x4f   :  { %695 = vmatprep.subr.bf16.mxu1 %v1081_v16  ;;  %v1123_v44 = vld [vmem:[#allocation8 + $0x104] ss:$8 sps:$4 sm:$0xff]   ;;  %v1125_v46 = vld [vmem:[#allocation8 + $0xd4] ss:$8 sps:$4 sm:$0xff]   ;;  %v1121_v47 = vld [vmem:[#allocation8 + $0x100] ss:$8 sps:$4 sm:$0xff]  }
  0x50   :  { %v1129_v48 = vld [vmem:[#allocation8 + $0x1f4] ss:$8 sps:$4 sm:$0xff]   ;;  %v1130_v49 = vld [vmem:[#allocation8 + $0xd0] ss:$8 sps:$4 sm:$0xff]   ;;  %v1131_v50 = vld [vmem:[#allocation8 + $0xc4] ss:$8 sps:$4 sm:$0xff]  }
  0x51   :  { %942 = vmatmul.mubr.msk.bf16.vlgmr.msra.gmra.mxu1 %vm164_vm0, %v93_v8  ;;  %661 = vmatpush1.bf16.msra.mxu0 %v1088_v21  ;;  %v1127_v51 = vld [vmem:[#allocation8 + $0x1f0] ss:$8 sps:$4 sm:$0xff]   ;;  %v1135_v52 = vld [vmem:[#allocation8 + $0x1e4] ss:$8 sps:$4 sm:$0xff]   ;;  %v1136_v53 = vld [vmem:[#allocation8 + $0xc0] ss:$8 sps:$4 sm:$0xff]  }
  0x52   :  { %696 = vmatpush1.bf16.msra.mxu1 %v1079_v19  ;;  %662 = vmatprep.subr.bf16.mxu0 %v1089_v22  ;;  %v1137_v54 = vld [vmem:[#allocation8 + $0xb4] ss:$8 sps:$4 sm:$0xff]   ;;  %v1133_v55 = vld [vmem:[#allocation8 + $0x1e0] ss:$8 sps:$4 sm:$0xff]   ;;  %v1142_v57 = vld [vmem:[#allocation8 + $0xb0] ss:$8 sps:$4 sm:$0xff]  }
  0x53   :  { %697 = vmatprep.subr.bf16.mxu1 %v1087_v20  ;;  %v1141_v56 = vld [vmem:[#allocation8 + $0x1d4] ss:$8 sps:$4 sm:$0xff]   ;;  %v1143_v58 = vld [vmem:[#allocation8 + $0xa4] ss:$8 sps:$4 sm:$0xff]   ;;  %v1139_v59 = vld [vmem:[#allocation8 + $0x1d0] ss:$8 sps:$4 sm:$0xff]  }
  0x54   :  { %v1147_v60 = vld [vmem:[#allocation8 + $0x1c4] ss:$8 sps:$4 sm:$0xff]   ;;  %v1148_v61 = vld [vmem:[#allocation8 + $0xa0] ss:$8 sps:$4 sm:$0xff]   ;;  %v1149_v63 = vld [vmem:[#allocation8 + $0x94] ss:$8 sps:$4 sm:$0xff]  }
  0x55   :  { %663 = vmatpush1.bf16.msra.mxu0 %v1094_v25  ;;  %v1145_v62 = vld [vmem:[#allocation8 + $0x1c0] ss:$8 sps:$4 sm:$0xff]   ;;  %v1153_v0 = vld [vmem:[#allocation8 + $0x1b4] ss:$8 sps:$4 sm:$0xff]   ;;  %v1151_v1 = vld [vmem:[#allocation8 + $0x1b0] ss:$8 sps:$4 sm:$0xff]  }
  0x56   :  { %698 = vmatpush1.bf16.msra.mxu1 %v1085_v23  ;;  %664 = vmatprep.subr.bf16.mxu0 %v1095_v26  ;;  %v1154_v2 = vld [vmem:[#allocation8 + $0x90] ss:$8 sps:$4 sm:$0xff]   ;;  %v1155_v3 = vld [vmem:[#allocation8 + $0x84] ss:$8 sps:$4 sm:$0xff]   ;;  %v1157_v5 = vld [vmem:[#allocation8 + $0x1a0] ss:$8 sps:$4 sm:$0xff]  }
  0x57   :  { %699 = vmatprep.subr.bf16.mxu1 %v1093_v24  ;;  %v1159_v4 = vld [vmem:[#allocation8 + $0x1a4] ss:$8 sps:$4 sm:$0xff]   ;;  %v1160_v6 = vld [vmem:[#allocation8 + $0x80] ss:$8 sps:$4 sm:$0xff]   ;;  %v1163_v7 = vld [vmem:[#allocation8 + $0x194] ss:$8 sps:$4 sm:$0xff]  }
  0x58   :  { %v1161_v8 = vld [vmem:[#allocation8 + $0x190] ss:$8 sps:$4 sm:$0xff]   ;;  %v1166_v9 = vld [vmem:[#allocation8 + $0x184] ss:$8 sps:$4 sm:$0xff]   ;;  %v1164_v10 = vld [vmem:[#allocation8 + $0x180] ss:$8 sps:$4 sm:$0xff]  }
  0x59   :  { %665 = vmatpush1.bf16.msra.mxu0 %v1100_v29  ;;  %v1167_v11 = vld [vmem:[#allocation10 + $0x78] sm:$0xff]   ;;  %v1381_v13 = vshrl.u32 %v104_v12, 7  ;;  %s922_s8 = sshll.u32 %s1323_s30, 4  ;;  %s923_s8 = int_to_ptr.vmem [resolvable:$true] %s922_s8 }
  0x5a   :  { %700 = vmatpush1.bf16.msra.mxu1 %v1091_v27  ;;  %666 = vmatprep.subr.bf16.mxu0 %v1101_v30  ;;  %v102_v15 = vld [vmem:[#allocation7] sm:$0xf]  ;;  %s1283_s9 = scalar_lea.vmem %s923_s8, 128  ;;  %p1288_p12 = scmp.lt.s32.totalorder %s923_s8, %s923_s8 }
  0x5b   :  { %701 = vmatprep.subr.bf16.mxu1 %v1099_v28  ;;  %v106_v14 = vsub.s32 0, %v1381_v13  ;;  %v110_v16 = vsub.s32 1, %v1381_v13  ;;  %v114_v21 = vsub.s32 2, %v1381_v13  ;;  %v118_v24 = vsub.s32 3, %v1381_v13  ;;  %v1007_v13 = vld [vmem:[%s1410_s6] ss:$0 sm:$0xff]  ;;  %p1284_p11 = scmp.ne.s32.totalorder %s923_s8, %s1283_s9  ;;  %p1289_p13 = scmp.lt.s32.totalorder %s1283_s9, %s1283_s9 }
  0x5d   :  { %667 = vmatpush1.bf16.msra.mxu0 %v1106_v33  ;;  %v107_v17 = vrot.slane %v102_v15, %v106_v14  ;;  %v111_v18 = vrot.slane %v102_v15, %v110_v16  ;;  %v115_v27 = vrot.slane %v102_v15, %v114_v21  ;;  %p1290_p0 = por %p1289_p13, %p1288_p12 }
  0x5e   :  { %702 = vmatpush1.bf16.msra.mxu1 %v1097_v31  ;;  %668 = vmatprep.subr.bf16.mxu0 %v1107_v34  ;;  %v119_v31 = vrot.slane %v102_v15, %v118_v24 }
  0x5f   :  { %703 = vmatprep.subr.bf16.mxu1 %v1105_v32  ;;  %v1168_v32 = vld [vmem:[#allocation10 + $0x38] sm:$0xff]   ;;  %p1291_p1 = pnand %p1290_p0, %p1284_p11 }
  0x61   :  { %669 = vmatpush1.bf16.msra.mxu0 %v1112_v37 }
  0x62   :  { %704 = vmatpush1.bf16.msra.mxu1 %v1103_v35  ;;  %670 = vmatprep.subr.bf16.mxu0 %v1113_v38  ;;  %v1169_v35 = vld [vmem:[#allocation10 + $0x70] sm:$0xff]  }
  0x63   :  { %705 = vmatprep.subr.bf16.mxu1 %v1111_v36 }
  0x65   :  { %671 = vmatpush2.bf16.msra.mxu0 %v1118_v41 }
  0x66   :  { %706 = vmatpush1.bf16.msra.mxu1 %v1109_v39  ;;  %672 = vmatprep.subr.bf16.mxu0 %v1119_v42  ;;  %v1170_v39 = vld [vmem:[#allocation10 + $0x30] sm:$0xff]   ;;  %v1171_v42 = vld [vmem:[#allocation10 + $0x68] sm:$0xff]  }
  0x67   :  { %707 = vmatprep.subr.bf16.mxu1 %v1117_v40 }
  0x69   :  { %673 = vmatpush2.bf16.msra.mxu0 %v1124_v45 }
  0x6a   :  { %708 = vmatpush1.bf16.msra.mxu1 %v1115_v43  ;;  %674 = vmatprep.subr.bf16.mxu0 %v1125_v46  ;;  %v1172_v46 = vld [vmem:[#allocation10 + $0x28] sm:$0xff]  }
  0x6b   :  { %709 = vmatprep.subr.bf16.mxu1 %v1123_v44 }
  0x6d   :  { %675 = vmatpush2.bf16.msra.mxu0 %v1130_v49  ;;  %v1174_v49 = vld [vmem:[#allocation10 + $0x20] sm:$0xff]  }
  0x6e   :  { %710 = vmatpush1.bf16.msra.mxu1 %v1121_v47  ;;  %676 = vmatprep.subr.bf16.mxu0 %v1131_v50  ;;  %v1175_v50 = vld [vmem:[#allocation10 + $0x58] sm:$0xff]  }
  0x6f   :  { %711 = vmatprep.subr.bf16.mxu1 %v1129_v48  ;;  %v1173_v48 = vld [vmem:[#allocation10 + $0x60] sm:$0xff]  }
  0x71   :  { %677 = vmatpush2.bf16.msra.mxu0 %v1136_v53  ;;  %v1178_v53 = vld [vmem:[#allocation10 + $0x10] sm:$0xff]  }
  0x72   :  { %712 = vmatpush2.bf16.msra.mxu1 %v1127_v51  ;;  %678 = vmatprep.subr.bf16.mxu0 %v1137_v54  ;;  %v1176_v51 = vld [vmem:[#allocation10 + $0x18] sm:$0xff]   ;;  %v1179_v54 = vld [vmem:[#allocation10 + $0x48] sm:$0xff]  }
  0x73   :  { %713 = vmatprep.subr.bf16.mxu1 %v1135_v52  ;;  %v1177_v52 = vld [vmem:[#allocation10 + $0x50] sm:$0xff]  }
  0x75   :  { %679 = vmatpush2.bf16.msra.mxu0 %v1142_v57  ;;  %v1182_v57 = vld [vmem:[#allocation10] sm:$0xff]  }
  0x76   :  { %714 = vmatpush2.bf16.msra.mxu1 %v1133_v55  ;;  %680 = vmatprep.subr.bf16.mxu0 %v1143_v58  ;;  %v1180_v55 = vld [vmem:[#allocation10 + $0x8] sm:$0xff]   ;;  %v322_v58 = vld [vmem:[%s1408_s4] sm:$0x3] }
  0x77   :  { %715 = vmatprep.subr.bf16.mxu1 %v1141_v56  ;;  %v1181_v56 = vld [vmem:[#allocation10 + $0x40] sm:$0xff]  }
  0x79   :  { %681 = vmatpush2.bf16.msra.mxu0 %v1148_v61  ;;  %v327_v61 = vrot.slane %v322_v58, %v106_v14 }
  0x7a   :  { %716 = vmatpush2.bf16.msra.mxu1 %v1139_v59  ;;  %682 = vmatprep.subr.bf16.mxu0 %v1149_v63  ;;  %v331_v63 = vrot.slane %v322_v58, %v110_v16 }
  0x7b   :  { %717 = vmatprep.subr.bf16.mxu1 %v1147_v60 }
  0x7d   :  { %683 = vmatpush2.bf16.msra.mxu0 %v1154_v2 }
  0x7e   :  { %718 = vmatpush2.bf16.msra.mxu1 %v1145_v62  ;;  %684 = vmatprep.subr.bf16.mxu0 %v1155_v3 }
  0x7f   :  { %719 = vmatprep.subr.bf16.mxu1 %v1153_v0 }
  0x81   :  { %685 = vmatpush2.bf16.msra.mxu0 %v1160_v6 }
  0x82   :  { %720 = vmatpush2.bf16.msra.mxu1 %v1151_v1  ;;  %1024 = vmatprep.subr.bf16.mxu0 %v1167_v11 }
  0x83   :  { %721 = vmatprep.subr.bf16.mxu1 %v1159_v4 }
  0x86   :  { %722 = vmatpush2.bf16.msra.mxu1 %v1157_v5 }
  0x87   :  { %723 = vmatprep.subr.bf16.mxu1 %v1163_v7 }
  0x8a   :  { %724 = vmatpush2.bf16.msra.mxu1 %v1161_v8 }
  0x8b   :  { %725 = vmatprep.subr.bf16.mxu1 %v1166_v9 }
  0x8e   :  { %726 = vmatpush2.bf16.msra.mxu1 %v1164_v10 }
 0x109   :  { %v202_v19 = vpop.f32.mrf.mxu1 }
 0x10a   :  { %v203_v20 = vadd.f32 %v202_v19, %v107_v17 }
 0x10b   :  { %v204_v22 = vpop.f32.mrf.mxu1 }
 0x10c   :  { %v205_v23 = vadd.f32 %v204_v22, %v111_v18  ;;  %v250_v25 = vmax.f32 %v203_v20, 0.0 }
 0x10d   :  { %v206_v26 = vpop.f32.mrf.mxu1 }
 0x10e   :  { %v251_v28 = vmax.f32 %v205_v23, 0.0  ;;  %v254_v33 = vpack.c.bf16 %v250_v25, %v250_v25 }
 0x10f   :  { %v207_v29 = vpop.f32.mrf.mxu1 }
 0x110   :  { %v255_v30 = vpack.c.bf16 %v251_v28, %v251_v28 }
 0x111   :  { %v243_v34 = vpop.f32.mrf.mxu1 }
 0x112   :  { %v244_v36 = vadd.f32 %v243_v34, %v115_v27  ;;  %686 = vmatprep.mubr.bf16.mxu0 %v255_v30 }
 0x113   :  { %v245_v37 = vpop.f32.mrf.mxu1  ;;  %687 = vmatmul.mubr.bf16.vlgmr.msra.gmra.mxu0 %v254_v33 }
 0x114   :  { %v246_v38 = vadd.f32 %v245_v37, %v119_v31  ;;  %1025 = vmatpush3.bf16.msra.mxu0 %v1168_v32  ;;  %v252_v40 = vmax.f32 %v244_v36, 0.0 }
 0x115   :  { %v247_v41 = vpop.f32.mrf.mxu1  ;;  %1026 = vmatprep.subr.bf16.mxu0 %v1169_v35 }
 0x116   :  { %v253_v43 = vmax.f32 %v246_v38, 0.0  ;;  %v256_v47 = vpack.c.bf16 %v252_v40, %v252_v40 }
 0x117   :  { %v248_v44 = vpop.f32.mrf.mxu1 }
 0x118   :  { %v257_v45 = vpack.c.bf16 %v253_v43, %v253_v43  ;;  %1027 = vmatpush3.bf16.msra.mxu0 %v1170_v39 }
 0x119   :  { %1028 = vmatprep.subr.bf16.mxu0 %v1171_v42 }
 0x11a   :  { %727 = vmatprep.mubr.bf16.mxu1 %v257_v45 }
 0x11b   :  { %728 = vmatmul.mubr.bf16.vlgmr.msra.gmra.mxu1 %v256_v47 }
 0x11c   :  { %1029 = vmatpush3.bf16.msra.mxu0 %v1172_v46 }
 0x11d   :  { %1030 = vmatprep.subr.bf16.mxu0 %v1173_v48 }
 0x120   :  { %1031 = vmatpush3.bf16.msra.mxu0 %v1174_v49 }
 0x121   :  { %1032 = vmatprep.subr.bf16.mxu0 %v1175_v50 }
 0x124   :  { %1033 = vmatpush3.bf16.msra.mxu0 %v1176_v51 }
 0x125   :  { %1034 = vmatprep.subr.bf16.mxu0 %v1177_v52 }
 0x128   :  { %1035 = vmatpush3.bf16.msra.mxu0 %v1178_v53 }
 0x129   :  { %1036 = vmatprep.subr.bf16.mxu0 %v1179_v54 }
 0x12c   :  { %1037 = vmatpush3.bf16.msra.mxu0 %v1180_v55 }
 0x12d   :  { %1038 = vmatprep.subr.bf16.mxu0 %v1181_v56 }
 0x130   :  { %1039 = vmatpush3.bf16.msra.mxu0 %v1182_v57 }
 0x1d3   :  { %v688_v59 = vpop.f32.mrf.mxu0 }
 0x1d4   :  { %v689_v1 = vadd.f32 %v688_v59, %v327_v61 }
 0x1d5   :  { %v690_v60 = vpop.f32.mrf.mxu0 }
 0x1d6   :  { %v691_v3 = vadd.f32 %v690_v60, %v331_v63 }
 0x1d7   :  { %v692_v62 = vpop.f32.mrf.mxu0 }
 0x1d9   :  { %v693_v0 = vpop.f32.mrf.mxu0 }
 0x1db   :  { %v729_v2 = vpop.f32.mrf.mxu1 }
 0x1dc   :  { %v730_v4 = vadd.f32 %v729_v2, %v689_v1 }
 0x1dd   :  { %v731_v5 = vpop.f32.mrf.mxu1 }
 0x1de   :  { %v732_v6 = vadd.f32 %v731_v5, %v691_v3  ;;  %v736_v7 = vmax.f32 %v730_v4, 0.0 }
 0x1df   :  { %v733_v8 = vpop.f32.mrf.mxu1 }
 0x1e0   :  { %v737_v9 = vmax.f32 %v732_v6, 0.0  ;;  %v738_v12 = vpack.c.bf16 %v736_v7, %v736_v7 }
 0x1e1   :  { %v734_v10 = vpop.f32.mrf.mxu1 }
 0x1e2   :  { %v739_v11 = vpack.c.bf16 %v737_v9, %v737_v9 }
 0x1e4   :  { %907 = vmatprep.mubr.bf16.mxu0 %v739_v11 }
 0x1e5   :  { %908 = vmatmul.mubr.bf16.vlgmr.msra.gmra.mxu0 %v738_v12 }
 0x2a5   :  { %v1040_v14 = vpop.f32.mrf.mxu0 }
 0x2a7   :  { %v1041_v15 = vpop.f32.mrf.mxu0 }
 0x2a8   :  { %v1042_v16 = vadd.f32 %v1041_v15, %v1040_v14 }
 0x2a9   :  { %v1043_v17 = vpop.f32.mrf.mxu0 }
 0x2aa   :  { %v910_v18 = vadd.f32 %v1042_v16, %v1007_v13 }
 0x2ab   :  { %v1044_v19 = vpop.f32.mrf.mxu0 }
 0x2ac   :  { %915 = vst [vmem:[#allocation11] sm:$0xff] %v910_v18 }
 0x2ad   :  { %1294 = shalt.err (!%p1291_p1)
}
 0x2ae   :  { %925 = dma.vmem_to_hbm [thread:$0]  %s923_s8, 128, %s1411_s7, [#allocation4]  }
 0x2af   :  { %1309 = dma.done.wait [#allocation4], 128  }
 0x2b0   :  { %1310 = vsyncadd [#allocation4], 4294967168 }
 0x2b1   :  { %929 = vsyncpa [#allocation3], 1 }
 0x2b2   :  { %930 = vsyncpa [#allocation6], 1 }
 0x2b3   :  { %931 = vsyncpa [#allocation9], 1 }
 0x2b4   :  { %932 = vsyncpa [#allocation4], 1 }

</bundles_post_ra>
